<compile_context>
chip_gen: v7x
topology: tpu7x:2x2x1
jax: 0.10.0
libtpu: 0.0.40
codegen_flags: <defaults>
</compile_context>

<pallas_src>
import math

import jax
import jax.numpy as jnp
from jax.experimental import pallas as pl
from jax.experimental.pallas import tpu as pltpu


def cell_type_encoder_kernel(x_ref, w1_ref, b1_ref, w2_ref, b2_ref, o_ref):
    # h^T = relu(W1 @ x^T + b1): NT matmul (contract last dims of both operands),
    # so the big x tile stays in its natural (tb, dim_in) layout.
    h_t = jax.lax.dot_general(
        w1_ref[...], x_ref[...],
        dimension_numbers=(((1,), (1,)), ((), ())),
        preferred_element_type=jnp.float32,
    )                                                     # (dim_mid, tb) f32
    h_t = jnp.maximum(h_t + b1_ref[...], 0.0)

    # logits^T = W2 @ h^T + b2  (tiny f32 matmul; the MXU is idle anyway).
    logits_t = jnp.dot(w2_ref[...], h_t,
                       preferred_element_type=jnp.float32) + b2_ref[...]  # (dim_out, tb)

    # Numerically stable softmax along the feature axis (axis 0); every op here
    # is lane-dense over the tb batch lanes.
    m = jnp.max(logits_t, axis=0, keepdims=True)          # (1, tb)
    e = jnp.exp(logits_t - m)                             # (dim_out, tb)
    denom = jnp.sum(e, axis=0, keepdims=True)             # (1, tb)
    o_ref[...] = (e * pl.reciprocal(denom, approx=True)).astype(o_ref.dtype)


def _round_up(n, m):
    return (n + m - 1) // m * m


def cell_type_encoder(x, w1, b1, w2, b2, *, tb=4096):
    """Fused CellTypeEncoder forward.

    x:  (B, dim_in)                        activations (f32 or bf16)
    w1: (dim_mid, dim_in),  b1: (dim_mid,)   layer1 (native PyTorch layout)
    w2: (dim_out, dim_mid), b2: (dim_out,)   layer2 (native PyTorch layout)
    Returns softmax(relu(x @ w1.T + b1) @ w2.T + b2), shape (B, dim_out).
    """
    B, dim_in = x.shape
    dim_mid = w1.shape[0]
    dim_out = w2.shape[0]
    dtype = x.dtype
    itemsize = jnp.dtype(dtype).itemsize

    # w1 feeds the MXU against the big x stream: match its dtype to x so a bf16
    # x is never upcast per tile (v5e has no bf16 VALU).  The rest stays f32.
    w1 = w1.astype(dtype)
    b1c = jnp.reshape(b1, (dim_mid, 1)).astype(jnp.float32)
    w2f = w2.astype(jnp.float32)
    b2c = jnp.reshape(b2, (dim_out, 1)).astype(jnp.float32)

    # Batch tile: multiple of 128 (lane-dense output blocks), capped at ~8 MiB of
    # x per buffer, and small enough that the grid has >= 2 steps so the
    # "parallel" axis shards across v7x's two TensorCores.  Batches with fewer
    # than 128 rows use a single full-batch block (block dims == array dims).
    if B >= 128:
        cap = max(128, ((8 << 20) // (dim_in * itemsize)) // 128 * 128)
        tb_eff = max(128, min((tb // 128) * 128, cap,
                              _round_up(pl.cdiv(B, 2), 128)))
    else:
        tb_eff = B
    grid = (pl.cdiv(B, tb_eff),)

    # VMEM budget: 3-deep x buffers + double-buffered output + resident weights
    # + f32 intermediates + slack; floor at the 32 MiB default, cap at 48 MiB to
    # keep headroom under v7x's 64 MiB/TC physical VMEM.
    needed = (
        3 * tb_eff * dim_in * itemsize
        + 2 * dim_out * tb_eff * itemsize
        + 2 * (dim_mid * dim_in + dim_out * dim_mid + dim_mid + dim_out) * 4
        + 6 * tb_eff * (dim_mid + dim_out) * 4
        + (4 << 20)
    )
    vmem_limit = int(min(max(needed, 32 << 20), 48 << 20))

    # Advisory: the kernel is HBM-bound on reading x.
    cost = pl.CostEstimate(
        flops=2 * B * (dim_in * dim_mid + dim_mid * dim_out),
        transcendentals=B * dim_out,
        bytes_accessed=B * (dim_in + dim_out) * itemsize
        + (dim_mid * dim_in + dim_out * dim_mid + dim_mid + dim_out) * 4,
    )

    # x: the only per-step HBM stream; 3-deep buffering hides DMA issue latency.
    x_spec = pl.BlockSpec(
        (tb_eff, dim_in), lambda i: (i, 0),
        pipeline_mode=pl.Buffered(3) if grid[0] > 1 else None,
    )

    out_t = pl.pallas_call(
        cell_type_encoder_kernel,
        out_shape=jax.ShapeDtypeStruct((dim_out, B), dtype),
        grid_spec=pltpu.PrefetchScalarGridSpec(
            num_scalar_prefetch=0,
            grid=grid,
            in_specs=[
                x_spec,
                # weights/biases: constant block index -> DMA'd once, VMEM-resident
                pl.BlockSpec((dim_mid, dim_in), lambda i: (0, 0)),
                pl.BlockSpec((dim_mid, 1), lambda i: (0, 0)),
                pl.BlockSpec((dim_out, dim_mid), lambda i: (0, 0)),
                pl.BlockSpec((dim_out, 1), lambda i: (0, 0)),
            ],
            out_specs=pl.BlockSpec((dim_out, tb_eff), lambda i: (0, i)),
        ),
        compiler_params=pltpu.CompilerParams(
            dimension_semantics=("parallel",),   # shard batch grid across TCs (v7x)
            vmem_limit_bytes=vmem_limit,
        ),
        cost_estimate=cost,
    )(x, w1, b1c, w2f, b2c)

    # (dim_out, B) -> (B, dim_out): tiny XLA transpose of B*dim_out elements.
    return out_t.T


def reference_forward(x, w1, b1, w2, b2):
    xf = x.astype(jnp.float32)
    h = jnp.maximum(xf @ w1.astype(jnp.float32).T + b1.astype(jnp.float32), 0.0)
    logits = h @ w2.astype(jnp.float32).T + b2.astype(jnp.float32)
    return jax.nn.softmax(logits, axis=-1)


if __name__ == "__main__":
    # Shapes consistent with the module: dim_mid = int(sqrt(dim_in / dim_out)).
    B = 16
    dim_in = 256
    dim_out = 4
    dim_mid = int(math.sqrt(dim_in / dim_out))  # = 8 (matches torch truncation)

    key = jax.random.PRNGKey(0)
    kx, k1w, k1b, k2w, k2b, kx3 = jax.random.split(key, 6)

    # PyTorch-Linear-style init, native PyTorch layouts: weight (out, in), bias (out,).
    lim1 = 1.0 / math.sqrt(dim_in)
    lim2 = 1.0 / math.sqrt(dim_mid)
    w1 = jax.random.uniform(k1w, (dim_mid, dim_in), jnp.float32, -lim1, lim1)
    b1 = jax.random.uniform(k1b, (dim_mid,), jnp.float32, -lim1, lim1)
    w2 = jax.random.uniform(k2w, (dim_out, dim_mid), jnp.float32, -lim2, lim2)
    b2 = jax.random.uniform(k2b, (dim_out,), jnp.float32, -lim2, lim2)

    # 1) small batch -> single full-batch block
    x = jax.random.normal(kx, (B, dim_in), jnp.float32)
    out = jax.block_until_ready(cell_type_encoder(x, w1, b1, w2, b2))
    ref = reference_forward(x, w1, b1, w2, b2)
    assert out.shape == (B, dim_out)
    assert jnp.allclose(out, ref, atol=2e-3), "mismatch vs reference (B=16)"
    assert jnp.allclose(jnp.sum(out, axis=-1), 1.0, atol=5e-3)

    # 2) odd small batch (still a single block; no pad/slice anywhere)
    x2 = jax.random.normal(kx, (10, dim_in), jnp.float32)
    out2 = jax.block_until_ready(cell_type_encoder(x2, w1, b1, w2, b2))
    ref2 = reference_forward(x2, w1, b1, w2, b2)
    assert out2.shape == (10, dim_out)
    assert jnp.allclose(out2, ref2, atol=2e-3), "mismatch vs reference (B=10)"

    # 3) multi-step grid with a ragged last block: exercises megacore sharding,
    #    the Buffered(3) x pipeline and masked out-of-bounds output columns.
    x3 = jax.random.normal(kx3, (1400, dim_in), jnp.float32)
    out3 = jax.block_until_ready(cell_type_encoder(x3, w1, b1, w2, b2, tb=512))
    ref3 = reference_forward(x3, w1, b1, w2, b2)
    assert out3.shape == (1400, dim_out)
    assert jnp.allclose(out3, ref3, atol=2e-3), "mismatch vs reference (B=1400)"

    # 4) bf16 x stream (halves the dominant HBM read; f32 MXU accumulation kept)
    x4 = x3[:1000].astype(jnp.bfloat16)
    out4 = jax.block_until_ready(cell_type_encoder(x4, w1, b1, w2, b2))
    ref4 = reference_forward(x4, w1, b1, w2, b2)
    assert out4.shape == (1000, dim_out)
    assert jnp.allclose(out4.astype(jnp.float32), ref4, atol=2e-2), "mismatch (bf16)"

    print("KERNEL_OK")
</pallas_src>

<mosaic_0001>
module attributes {stable_mosaic.version = 11 : i64} {
  func.func @cell_type_encoder_kernel(%arg0: i32, %arg1: memref<16x256xf32, #tpu.memory_space<vmem>>, %arg2: memref<8x256xf32, #tpu.memory_space<vmem>>, %arg3: memref<8x1xf32, #tpu.memory_space<vmem>>, %arg4: memref<4x8xf32, #tpu.memory_space<vmem>>, %arg5: memref<4x1xf32, #tpu.memory_space<vmem>>, %arg6: memref<4x16xf32, #tpu.memory_space<vmem>>) attributes {dimension_semantics = [#tpu.dimension_semantics<parallel>], iteration_bounds = array<i64: 1>, scalar_prefetch = 0 : i64, scratch_operands = 0 : i64, tpu.core_type = #tpu.core_type<tc>, window_params = [{transform_indices = @transform_0, window_bounds = array<i64: 16, 256>}, {pipeline_mode = #tpu.pipeline_mode<synchronous>, transform_indices = @transform_1, window_bounds = array<i64: 8, 256>}, {pipeline_mode = #tpu.pipeline_mode<synchronous>, transform_indices = @transform_2, window_bounds = array<i64: 8, 1>}, {pipeline_mode = #tpu.pipeline_mode<synchronous>, transform_indices = @transform_3, window_bounds = array<i64: 4, 8>}, {pipeline_mode = #tpu.pipeline_mode<synchronous>, transform_indices = @transform_4, window_bounds = array<i64: 4, 1>}, {transform_indices = @transform_5, window_bounds = array<i64: 4, 16>}]} {
    %c0 = arith.constant 0 : index
    %c0_0 = arith.constant 0 : index
    %0 = vector.load %arg2[%c0, %c0_0] : memref<8x256xf32, #tpu.memory_space<vmem>>, vector<8x256xf32>
    %c0_1 = arith.constant 0 : index
    %c0_2 = arith.constant 0 : index
    %1 = vector.load %arg1[%c0_1, %c0_2] : memref<16x256xf32, #tpu.memory_space<vmem>>, vector<16x256xf32>
    %cst = arith.constant dense<0.000000e+00> : vector<8x16xf32>
    %2 = tpu.matmul %0, %1, %cst {dimension_numbers = #tpu.dot_dimension_numbers<[1], [1], [0], [0], [0, 0, 1, 0], [], []>} : vector<8x256xf32>, vector<16x256xf32>, vector<8x16xf32> -> vector<8x16xf32>
    %c0_3 = arith.constant 0 : index
    %c0_4 = arith.constant 0 : index
    %3 = vector.load %arg3[%c0_3, %c0_4] : memref<8x1xf32, #tpu.memory_space<vmem>>, vector<8x1xf32>
    %4 = vector.broadcast %3 : vector<8x1xf32> to vector<8x16xf32>
    %5 = arith.addf %2, %4 : vector<8x16xf32>
    %cst_5 = arith.constant 0.000000e+00 : f32
    %6 = vector.broadcast %cst_5 : f32 to vector<8x16xf32>
    %7 = arith.maximumf %5, %6 : vector<8x16xf32>
    %c0_6 = arith.constant 0 : index
    %c0_7 = arith.constant 0 : index
    %8 = vector.load %arg4[%c0_6, %c0_7] : memref<4x8xf32, #tpu.memory_space<vmem>>, vector<4x8xf32>
    %cst_8 = arith.constant dense<0.000000e+00> : vector<4x16xf32>
    %9 = tpu.matmul %8, %7, %cst_8 {dimension_numbers = #tpu.dot_dimension_numbers<[1], [0], [0], [1], [0, 0, 1, 1], [], []>} : vector<4x8xf32>, vector<8x16xf32>, vector<4x16xf32> -> vector<4x16xf32>
    %c0_9 = arith.constant 0 : index
    %c0_10 = arith.constant 0 : index
    %10 = vector.load %arg5[%c0_9, %c0_10] : memref<4x1xf32, #tpu.memory_space<vmem>>, vector<4x1xf32>
    %11 = vector.broadcast %10 : vector<4x1xf32> to vector<4x16xf32>
    %12 = arith.addf %9, %11 : vector<4x16xf32>
    %cst_11 = arith.constant dense<0xFF800000> : vector<16xf32>
    %13 = vector.multi_reduction <maximumf>, %12, %cst_11 [0] : vector<4x16xf32> to vector<16xf32>
    %14 = vector.shape_cast %13 : vector<16xf32> to vector<1x16xf32>
    %15 = vector.broadcast %14 : vector<1x16xf32> to vector<4x16xf32>
    %16 = arith.subf %12, %15 : vector<4x16xf32>
    %17 = math.exp %16 : vector<4x16xf32>
    %cst_12 = arith.constant dense<0.000000e+00> : vector<16xf32>
    %18 = vector.multi_reduction <add>, %17, %cst_12 [0] : vector<4x16xf32> to vector<16xf32>
    %19 = vector.shape_cast %18 : vector<16xf32> to vector<1x16xf32>
    %20 = tpu.reciprocal %19 {approx = true} : vector<1x16xf32> -> vector<1x16xf32>
    %21 = vector.broadcast %20 : vector<1x16xf32> to vector<4x16xf32>
    %22 = arith.mulf %17, %21 : vector<4x16xf32>
    %c0_13 = arith.constant 0 : index
    %c0_14 = arith.constant 0 : index
    %23 = vector.load %arg6[%c0_13, %c0_14] : memref<4x16xf32, #tpu.memory_space<vmem>>, vector<4x16xf32>
    tpu.vector_store %arg6[%c0_13, %c0_14], %22 {strides = array<i32>} : memref<4x16xf32, #tpu.memory_space<vmem>>, vector<4x16xf32>,
    return
  }
  func.func @transform_0(%arg0: i32) -> (i32, i32) {
    %c0_i32 = arith.constant 0 : i32
    %c0_i32_0 = arith.constant 0 : i32
    return %arg0, %c0_i32 : i32, i32
  }
  func.func @transform_1(%arg0: i32) -> (i32, i32) {
    %c0_i32 = arith.constant 0 : i32
    %c0_i32_0 = arith.constant 0 : i32
    %c0_i32_1 = arith.constant 0 : i32
    return %c0_i32, %c0_i32_0 : i32, i32
  }
  func.func @transform_2(%arg0: i32) -> (i32, i32) {
    %c0_i32 = arith.constant 0 : i32
    %c0_i32_0 = arith.constant 0 : i32
    %c0_i32_1 = arith.constant 0 : i32
    return %c0_i32, %c0_i32_0 : i32, i32
  }
  func.func @transform_3(%arg0: i32) -> (i32, i32) {
    %c0_i32 = arith.constant 0 : i32
    %c0_i32_0 = arith.constant 0 : i32
    %c0_i32_1 = arith.constant 0 : i32
    return %c0_i32, %c0_i32_0 : i32, i32
  }
  func.func @transform_4(%arg0: i32) -> (i32, i32) {
    %c0_i32 = arith.constant 0 : i32
    %c0_i32_0 = arith.constant 0 : i32
    %c0_i32_1 = arith.constant 0 : i32
    return %c0_i32, %c0_i32_0 : i32, i32
  }
  func.func @transform_5(%arg0: i32) -> (i32, i32) {
    %c0_i32 = arith.constant 0 : i32
    %c0_i32_0 = arith.constant 0 : i32
    return %c0_i32, %arg0 : i32, i32
  }
}

</mosaic_0001>

<bundles_post_ra>
// kernel: tpu_custom_call.1
= control target key start
LH: loop header
LB: loop body
LE: loop exit
PB: predicated region body
PF: predicated region fallthrough
CT: control target
= control target key end

     0   :  { %10 = vsyncpa [#allocation3], 0  ;;  %s386_s0 = inlined_call_operand.hbm [shape: f32[16,256], index: 0, kind: input, shape index: {}]   ;;  %s387_s1 = inlined_call_operand.vmem [shape: f32[8,256], index: 1, kind: input, shape index: {}]   ;;  %s388_s2 = inlined_call_operand.vmem [shape: f32[8,1], index: 2, kind: input, shape index: {}]   ;;  %s389_s3 = inlined_call_operand.vmem [shape: f32[4,8], index: 3, kind: input, shape index: {}]   ;;  %s390_s4 = inlined_call_operand.vmem [shape: f32[4,1], index: 4, kind: input, shape index: {}]   ;;  %s391_s5 = inlined_call_operand.hbm [shape: f32[4,16], index: 5, kind: output, shape index: {}]  }
   0x1   :  { %11 = vsyncpa [#allocation4], 0  ;;  %s307_s18 = smov [#allocation2]   ;;  %s259_s22 = scalar_lea.hbm %s386_s0, 512 }
   0x2   :  { %s17_s19 = sshll.u32 %s307_s18, 4  ;;  %p260_p0 = scmp.ne.s32.totalorder %s386_s0, %s259_s22  ;;  %s18_s19 = int_to_ptr.vmem [resolvable:$true] %s17_s19 }
   0x3   :  { %p263_p1 = scmp.lt.u32.totalorder %s259_s22, %s386_s0 }
   0x5   :  { %p265_p2 = pnand %p263_p1, %p260_p0 }
   0x7   :  { %268 = shalt.err (!%p265_p2)
}
   0x8   :  { %s269_s27 = scalar_lea.vmem %s18_s19, 512  ;;  %p274_p4 = scmp.lt.s32.totalorder %s18_s19, %s18_s19 }
   0x9   :  { %p270_p3 = scmp.ne.s32.totalorder %s18_s19, %s269_s27  ;;  %p275_p5 = scmp.lt.s32.totalorder %s269_s27, %s269_s27 }
   0xb   :  { %p276_p6 = por %p275_p5, %p274_p4 }
   0xd   :  { %p277_p7 = pnand %p276_p6, %p270_p3 }
   0xf   :  { %280 = shalt.err (!%p277_p7)
}
  0x10   :  { %s308_s28 = smov 256   ;;  %s309_s29 = smov 16  }
  0x11   :  { %23 = dma.hbm_to_vmem [thread:$0]  %s386_s0, 512, %s18_s19, [#allocation3], %s308_s28, %s308_s28, %s309_s29  }
  0x12   :  { %303 = dma.done.wait [#allocation3], 512  }
  0x13   :  { %304 = vsyncadd [#allocation3], 4294966784  ;;  %v310_v0 = vmov 0   ;;  %v38_v1 = vld [vmem:[#allocation2 + $0x8] sm:$0xff]  ;;  %v40_v2 = vld [vmem:[#allocation2 + $0x18] sm:$0xff]  ;;  %v311_v11 = vmov 0.0  }
  0x14   :  { %254 = vset.pattern.permute.xlu0 %v310_v0  ;;  %v37_v3 = vld [vmem:[#allocation2] sm:$0xff]  ;;  %v243_v4 = vpack.c.bf16 %v40_v2, %v38_v1  ;;  %v39_v5 = vld [vmem:[#allocation2 + $0x10] sm:$0xff]  ;;  %v36_v6 = vld [vmem:[%s387_s1 + $0x8] sm:$0xff]  ;;  %238 = vmatprep.subr.mxu1 %v311_v11  ;;  %vm312_vm0 = vmmov 0   ;;  %vm125_vm1 = vcmask 64512   ;;  %vm199_vm2 = vcmask 125952  }
  0x15   :  { %v245_v7 = vpack.c.bf16 %v39_v5, %v37_v3  ;;  %111 = vmatprep.mubr.f32.mxu0 %v36_v6  ;;  %v41_v8 = vld [vmem:[%s388_s2] sm:$0xff]  ;;  %240 = vmatprep.mubr.msk.f32.mxu1 %vm312_vm0, %v311_v11 }
  0x16   :  { %244 = vmatprep.subr.bf16.mxu0 %v243_v4  ;;  %44 = vperm.xlu0 %254, %v41_v8   ;;  %v119_v9 = vld [vmem:[%s390_s4] sm:$0xf] }
  0x17   :  { %246 = vmatpush1.bf16.xpose.msra.mxu0 %v245_v7  ;;  %v35_v10 = vld [vmem:[%s387_s1] sm:$0xff]  ;;  %s313_s1 = smov [#allocation5]  }
  0x18   :  { %v118_v17 = vld [vmem:[%s389_s3] sm:$0xf]  ;;  %s226_s3 = sshll.u32 %s313_s1, 4  ;;  %s227_s3 = int_to_ptr.vmem [resolvable:$true] %s226_s3 }
  0x19   :  { %s281_s4 = scalar_lea.vmem %s227_s3, 64  ;;  %p286_p9 = scmp.lt.s32.totalorder %s227_s3, %s227_s3 }
  0x1a   :  { %122 = vperm.xlu0 %254, %v119_v9   ;;  %p282_p8 = scmp.ne.s32.totalorder %s227_s3, %s281_s4  ;;  %p287_p10 = scmp.lt.s32.totalorder %s281_s4, %s281_s4 }
  0x1c   :  { %p288_p11 = por %p287_p10, %p286_p9 }
  0x1e   :  { %112 = vmatmul.mubr.f32.vlgmr.msra.gmra.mrb[0].mxu0 %v35_v10  ;;  %p289_p12 = pnand %p288_p11, %p282_p8 }
  0x95   :  { %v45_v12 = vpop.permute.xlu0 %44 }
  0x99   :  { %v123_v18 = vpop.permute.xlu0 %122 }
  0xf1   :  { %v113_v13 = vpop.f32.mrb[0].mxu0 }
  0xf2   :  { %v114_v14 = vadd.f32 %v113_v13, %v45_v12  ;;  %v115_v15 = vpop.f32.mrb[1].mxu0 }
  0xf4   :  { %v117_v16 = vmax.f32 %v114_v14, 0.0 }
  0xf6   :  { %239 = vmatpush3.msra.mxu1 %v117_v16 }
  0xf7   :  { %241 = vmatmul.mubr.msk.f32.vlgmr.msra.gmra.mrb[0].mxu1 %vm125_vm1, %v118_v17 }
 0x1ca   :  { %v195_v19 = vpop.f32.mrb[0].mxu1 }
 0x1cb   :  { %v196_v20 = vadd.f32 %v195_v19, %v123_v18  ;;  %v242_v21 = vpop.f32.mrb[1].mxu1 }
 0x1cd   :  { %v200_v22 = vsel %vm199_vm2, %v196_v20, -inf }
 0x1ce   :  { %v201_v23 = vrot.slane %v200_v22, 4 }
 0x1d0   :  { %v202_v24 = vmax.f32 %v200_v22, %v201_v23 }
 0x1d2   :  { %v203_v25 = vrot.slane %v202_v24, 2 }
 0x1d4   :  { %v204_v26 = vmax.f32 %v202_v24, %v203_v25 }
 0x1d6   :  { %v205_v27 = vrot.slane %v204_v26, 1 }
 0x1d8   :  { %v206_v28 = vmax.f32 %v204_v26, %v205_v27 }
 0x1da   :  { %v207_v29 = vsub.f32 %v196_v20, %v206_v28 }
 0x1dc   :  { %v208_v30 = vmul.f32 1.442695, %v207_v29 }
 0x1de   :  { %255 = vpow2.f32 %v208_v30 }
 0x1e8   :  { %v256_v31 = vpop.eup %255 }
 0x1e9   :  { %v210_v32 = vsel %vm199_vm2, %v256_v31, 0.0 }
 0x1ea   :  { %v211_v33 = vrot.slane %v210_v32, 4 }
 0x1ec   :  { %v212_v34 = vadd.f32 %v211_v33, %v210_v32 }
 0x1ee   :  { %v213_v35 = vrot.slane %v212_v34, 2 }
 0x1f0   :  { %v214_v36 = vadd.f32 %v213_v35, %v212_v34 }
 0x1f2   :  { %v215_v37 = vrot.slane %v214_v36, 1 }
 0x1f4   :  { %v216_v38 = vadd.f32 %v215_v37, %v214_v36 }
 0x1f6   :  { %257 = vrcp.f32 %v216_v38 }
 0x200   :  { %v258_v39 = vpop.eup %257 }
 0x201   :  { %v218_v40 = vmul.f32 %v258_v39, %v256_v31 }
 0x203   :  { %219 = vst.msk [vmem:[#allocation5] sm:$0xf] %vm199_vm2, %v218_v40 }
 0x204   :  { %292 = shalt.err (!%p289_p12)
}
 0x205   :  { %s293_s17 = scalar_lea.hbm %s391_s5, 64 }
 0x206   :  { %p294_p13 = scmp.ne.s32.totalorder %s391_s5, %s293_s17  ;;  %p297_p0 = scmp.lt.u32.totalorder %s293_s17, %s391_s5 }
 0x208   :  { %p299_p1 = pnand %p297_p0, %p294_p13 }
 0x20a   :  { %302 = shalt.err (!%p299_p1)
}
 0x20b   :  { %229 = dma.vmem_to_hbm [thread:$0]  %s227_s3, 64, %s391_s5, [#allocation4]  }
 0x20c   :  { %305 = dma.done.wait [#allocation4], 64  }
 0x20d   :  { %306 = vsyncadd [#allocation4], 4294967232 }
 0x20e   :  { %233 = vsyncpa [#allocation3], 1 }
 0x20f   :  { %234 = vsyncpa [#allocation4], 1 }

</bundles_post_ra>
